<compile_context>
chip_gen: v7x
topology: tpu7x:2x2x1
jax: 0.10.0
libtpu: 0.0.40
codegen_flags: <defaults>
</compile_context>

<pallas_src>
import functools

import jax
import jax.numpy as jnp
from jax.experimental import pallas as pl
from jax.experimental.pallas import tpu as pltpu

LN_EPS = 1e-5  # torch.nn.LayerNorm default


def _layernorm(v, w, b):
    mu = jnp.mean(v, axis=-1, keepdims=True)
    var = jnp.mean((v - mu) ** 2, axis=-1, keepdims=True)
    return (v - mu) * jax.lax.rsqrt(var + LN_EPS) * w + b


# ----------------------------------------------------------------------------
# Kernel 1: qkv = LN1(x) @ qkv_w   (q-scale pre-folded into qkv_w)
#           grid = (B*N // tm,), bf16 output
# ----------------------------------------------------------------------------
def ln_qkv_kernel(x_ref, n1w_ref, n1b_ref, qkvw_ref, qkv_ref):
    x = x_ref[...].astype(jnp.float32)                                  # (tm, C)
    h = _layernorm(x, n1w_ref[...], n1b_ref[...])
    qkv_ref[...] = jnp.dot(h.astype(jnp.bfloat16), qkvw_ref[...],
                           preferred_element_type=jnp.float32).astype(jnp.bfloat16)


# ----------------------------------------------------------------------------
# Kernel 2: x_attn = x + proj(softmax(q k^T) v)     grid = (B, num_head_groups)
#   * q/k/v arrive as lane-dense (N, GW) bf16 blocks (GW = group_heads * head_dim >= 128)
#   * proj + residual accumulated across the head-group axis into a VMEM scratch,
#     written once to the output on the last group (P3 accumulator pattern).
# ----------------------------------------------------------------------------
def attn_core_kernel(group_heads, head_dim,
                     x_ref, q_ref, k_ref, v_ref, pw_ref, pb_ref,
                     o_ref, acc_ref):
    g = pl.program_id(1)

    @pl.when(g == 0)
    def _():
        # residual + proj bias initialise the accumulator (f32)
        acc_ref[...] = x_ref[0].astype(jnp.float32) + pb_ref[...]

    q = q_ref[0]                                                        # (N, GW) bf16
    k = k_ref[0]
    v = v_ref[0]

    head_outs = []
    for h in range(group_heads):                 # small, bounded by the group grid axis
        lo, hi = h * head_dim, (h + 1) * head_dim
        # q @ k^T via dot_general contracting last dims (no explicit transpose).
        s = jax.lax.dot_general(q[:, lo:hi], k[:, lo:hi],
                                (((1,), (1,)), ((), ())),
                                preferred_element_type=jnp.float32)     # (N, N) f32
        s = s - jnp.max(s, axis=-1, keepdims=True)
        p = jnp.exp(s)
        p = p * pl.reciprocal(jnp.sum(p, axis=-1, keepdims=True), approx=True)
        head_outs.append(
            jnp.dot(p.astype(jnp.bfloat16), v[:, lo:hi],
                    preferred_element_type=jnp.float32).astype(jnp.bfloat16))

    grp = head_outs[0] if group_heads == 1 else jnp.concatenate(head_outs, axis=-1)
    # partial projection with this group's rows of proj_w (K = GW >= 128 on the MXU)
    acc_ref[...] += jnp.dot(grp, pw_ref[...], preferred_element_type=jnp.float32)

    @pl.when(g == pl.num_programs(1) - 1)
    def _():
        o_ref[0] = acc_ref[...].astype(o_ref.dtype)


# ----------------------------------------------------------------------------
# Kernel 3: out = x_attn + fc2(gelu(fc1(LN2(x_attn))))   grid = (B*N // tm,)
# ----------------------------------------------------------------------------
def mlp_kernel(xa_ref, n2w_ref, n2b_ref, fc1w_ref, fc1b_ref, fc2w_ref, fc2b_ref,
               o_ref):
    xa = xa_ref[...].astype(jnp.float32)                                # (tm, C)
    h = _layernorm(xa, n2w_ref[...], n2b_ref[...])
    m = jnp.dot(h.astype(jnp.bfloat16), fc1w_ref[...],
                preferred_element_type=jnp.float32) + fc1b_ref[...]
    # exact erf GELU == torch.nn.GELU() default (tanh approx would be EUP work but
    # changes numerics -> keep exact; switch only if measured VPU-bound).
    m = jax.nn.gelu(m, approximate=False)
    m = jnp.dot(m.astype(jnp.bfloat16), fc2w_ref[...],
                preferred_element_type=jnp.float32) + fc2b_ref[...]
    o_ref[...] = (xa + m).astype(o_ref.dtype)


# ----------------------------------------------------------------------------
# Host-side helpers / wrapper
# ----------------------------------------------------------------------------
def _row_tile(n_rows, target):
    """Largest divisor of n_rows <= target that is a multiple of 8 (else full n_rows)."""
    if n_rows <= target:
        return n_rows
    for t in range(min(target, n_rows), 7, -1):
        if n_rows % t == 0 and t % 8 == 0:
            return t
    return n_rows


def _head_group(num_heads, head_dim):
    """Smallest divisor g of num_heads with (g*head_dim) % 128 == 0 (lane-dense group)."""
    for g in range(1, num_heads + 1):
        if num_heads % g == 0 and (g * head_dim) % 128 == 0:
            return g
    return num_heads


def _vmem_limit_bytes():
    """Generation-aware scoped-VMEM budget (leave headroom for compiler scratch)."""
    cap = 128 * 1024 * 1024
    try:
        cap = int(getattr(pltpu.get_tpu_info(), "vmem_capacity_bytes", cap))
    except Exception:
        pass
    # 96 MiB on 128-MiB parts (v5e/v6e), ~48 MiB on v7x (64 MiB physical)
    return min((cap * 3) // 4, 96 * 1024 * 1024)


def block_forward(x, params, num_heads, token_tile=512):
    B, N, C = x.shape
    assert C % num_heads == 0, "dim must be divisible by num_heads"
    assert C % 128 == 0, "dim must be a multiple of 128 for lane-dense tiling"
    D = C // num_heads
    GH = _head_group(num_heads, D)           # heads per group
    GW = GH * D                              # group lane width (multiple of 128)
    num_groups = C // GW
    Ch = params["fc1_w"].shape[1]
    bf16 = jnp.bfloat16
    scale = D ** -0.5

    # bf16 weights for the MXU; q-scale folded into the q output columns of qkv_w.
    qkv_w = params["qkv_w"].at[:, :C].multiply(scale).astype(bf16)
    proj_w = params["proj_w"].astype(bf16)
    fc1_w = params["fc1_w"].astype(bf16)
    fc2_w = params["fc2_w"].astype(bf16)

    # Whole-array, single-buffered VMEM residency for small parameters.
    vmem_spec = pl.BlockSpec(memory_space=pltpu.MemorySpace.VMEM)
    vmem_limit = _vmem_limit_bytes()

    BN = B * N
    tm = _row_tile(BN, token_tile)
    x2 = x.reshape(BN, C)

    # -------------------- Kernel 1: LN1 + QKV --------------------
    qkv = pl.pallas_call(
        ln_qkv_kernel,
        out_shape=jax.ShapeDtypeStruct((BN, 3 * C), bf16),
        grid=(BN // tm,),
        in_specs=[pl.BlockSpec((tm, C), lambda i: (i, 0)),
                  vmem_spec, vmem_spec, vmem_spec],
        out_specs=pl.BlockSpec((tm, 3 * C), lambda i: (i, 0)),
        compiler_params=pltpu.CompilerParams(
            dimension_semantics=("parallel",),
            vmem_limit_bytes=vmem_limit),
        cost_estimate=pl.CostEstimate(
            flops=2 * BN * C * 3 * C,
            transcendentals=BN,
            bytes_accessed=BN * C * 4 + BN * 3 * C * 2 + 3 * C * C * 2),
    )(x2, params["norm1_w"], params["norm1_b"], qkv_w)
    qkv = qkv.reshape(B, N, 3 * C)

    # -------------------- Kernel 2: attention + proj + residual --------------------
    attn_flops = B * (4 * N * N * C + 2 * N * C * C)
    attn_bytes = B * (N * 3 * C * 2 + 2 * N * C * 4) + C * C * 2 + C * 4
    x_attn = pl.pallas_call(
        functools.partial(attn_core_kernel, GH, D),
        out_shape=jax.ShapeDtypeStruct((B, N, C), x.dtype),
        grid=(B, num_groups),
        in_specs=[
            pl.BlockSpec((1, N, C), lambda b, g: (b, 0, 0)),                    # x (residual)
            pl.BlockSpec((1, N, GW), lambda b, g: (b, 0, g)),                   # q group
            pl.BlockSpec((1, N, GW), lambda b, g: (b, 0, num_groups + g)),      # k group
            pl.BlockSpec((1, N, GW), lambda b, g: (b, 0, 2 * num_groups + g)),  # v group
            pl.BlockSpec((GW, C), lambda b, g: (g, 0)),                         # proj_w rows
            vmem_spec,                                                          # proj_b
        ],
        out_specs=pl.BlockSpec((1, N, C), lambda b, g: (b, 0, 0)),
        scratch_shapes=[pltpu.VMEM((N, C), jnp.float32)],                       # proj accumulator
        compiler_params=pltpu.CompilerParams(
            dimension_semantics=("parallel", "arbitrary"),
            vmem_limit_bytes=vmem_limit),
        cost_estimate=pl.CostEstimate(
            flops=attn_flops,
            transcendentals=B * num_heads * N * N,
            bytes_accessed=attn_bytes),
    )(x, qkv, qkv, qkv, proj_w, params["proj_b"])

    # -------------------- Kernel 3: LN2 + MLP + residual --------------------
    xa2 = x_attn.reshape(BN, C)
    out = pl.pallas_call(
        mlp_kernel,
        out_shape=jax.ShapeDtypeStruct((BN, C), x.dtype),
        grid=(BN // tm,),
        in_specs=[pl.BlockSpec((tm, C), lambda i: (i, 0)),
                  vmem_spec, vmem_spec, vmem_spec, vmem_spec, vmem_spec, vmem_spec],
        out_specs=pl.BlockSpec((tm, C), lambda i: (i, 0)),
        compiler_params=pltpu.CompilerParams(
            dimension_semantics=("parallel",),
            vmem_limit_bytes=vmem_limit),
        cost_estimate=pl.CostEstimate(
            flops=4 * BN * C * Ch,
            transcendentals=BN * Ch,
            bytes_accessed=2 * BN * C * 4 + 2 * C * Ch * 2 + (2 * C + Ch + C) * 4),
    )(xa2, params["norm2_w"], params["norm2_b"],
      fc1_w, params["fc1_b"], fc2_w, params["fc2_b"])
    return out.reshape(B, N, C)


def init_params(key, dim, num_heads, mlp_ratio=4.0):
    """Deterministic synthetic params matching Block(dim, num_heads, qkv_bias=False)."""
    hidden = int(dim * mlp_ratio)
    ks = jax.random.split(key, 4)
    s = 0.02
    f32 = jnp.float32
    return {
        "norm1_w": jnp.ones((1, dim), f32),
        "norm1_b": jnp.zeros((1, dim), f32),
        # nn.Linear(dim, 3*dim, bias=False), stored transposed -> (dim, 3*dim)
        "qkv_w":  (s * jax.random.normal(ks[0], (dim, 3 * dim))).astype(f32),
        # nn.Linear(dim, dim) with bias, stored transposed -> (dim, dim)
        "proj_w": (s * jax.random.normal(ks[1], (dim, dim))).astype(f32),
        "proj_b": jnp.full((1, dim), 0.01, f32),
        "norm2_w": jnp.ones((1, dim), f32),
        "norm2_b": jnp.zeros((1, dim), f32),
        # Mlp: fc1 (dim -> hidden), fc2 (hidden -> dim), both with bias
        "fc1_w":  (s * jax.random.normal(ks[2], (dim, hidden))).astype(f32),
        "fc1_b":  jnp.full((1, hidden), 0.02, f32),
        "fc2_w":  (s * jax.random.normal(ks[3], (hidden, dim))).astype(f32),
        "fc2_b":  jnp.full((1, dim), -0.01, f32),
    }


def block_ref(x, p, num_heads):
    """Pure-JAX f32 reference (mirrors the PyTorch forward exactly)."""
    def ln(v, w, b):
        mu = v.mean(-1, keepdims=True)
        var = ((v - mu) ** 2).mean(-1, keepdims=True)
        return (v - mu) / jnp.sqrt(var + LN_EPS) * w + b

    B, N, C = x.shape
    D = C // num_heads
    h = ln(x, p["norm1_w"][0], p["norm1_b"][0])
    qkv = h @ p["qkv_w"]
    q, k, v = jnp.split(qkv, 3, axis=-1)
    q = q.reshape(B, N, num_heads, D).transpose(0, 2, 1, 3)
    k = k.reshape(B, N, num_heads, D).transpose(0, 2, 1, 3)
    v = v.reshape(B, N, num_heads, D).transpose(0, 2, 1, 3)
    a = jax.nn.softmax((q @ k.transpose(0, 1, 3, 2)) * (D ** -0.5), axis=-1)
    av = (a @ v).transpose(0, 2, 1, 3).reshape(B, N, C)
    x_attn = x + av @ p["proj_w"] + p["proj_b"][0]
    h2 = ln(x_attn, p["norm2_w"][0], p["norm2_b"][0])
    m = jax.nn.gelu(h2 @ p["fc1_w"] + p["fc1_b"][0], approximate=False)
    m = m @ p["fc2_w"] + p["fc2_b"][0]
    return x_attn + m


if __name__ == "__main__":
    # C a multiple of 128 so every tile is lane-dense; N small for a quick check.
    B, N, C = 2, 8, 128
    NUM_HEADS = 4  # head_dim = 32 -> head group of 4 (GW = 128)

    key = jax.random.PRNGKey(0)
    kx, kp = jax.random.split(key)
    x = jax.random.normal(kx, (B, N, C), dtype=jnp.float32)
    params = init_params(kp, C, NUM_HEADS, mlp_ratio=4.0)

    out = jax.block_until_ready(block_forward(x, params, NUM_HEADS))

    ref = jax.block_until_ready(block_ref(x, params, NUM_HEADS))
    assert out.shape == (B, N, C)
    # bf16 MXU compute with f32 accumulation -> compare at mixed-precision tolerance.
    assert jnp.allclose(out, ref, rtol=1e-2, atol=1e-2), "mismatch vs JAX reference"

    print("KERNEL_OK")
</pallas_src>

<mosaic_0001>
module attributes {stable_mosaic.version = 11 : i64} {
  func.func @ln_qkv_kernel(%arg0: i32, %arg1: memref<16x128xf32, #tpu.memory_space<vmem>>, %arg2: memref<1x128xf32, #tpu.memory_space<vmem>>, %arg3: memref<1x128xf32, #tpu.memory_space<vmem>>, %arg4: memref<128x384xbf16, #tpu.memory_space<vmem>>, %arg5: memref<16x384xbf16, #tpu.memory_space<vmem>>) attributes {dimension_semantics = [#tpu.dimension_semantics<parallel>], iteration_bounds = array<i64: 1>, scalar_prefetch = 0 : i64, scratch_operands = 0 : i64, tpu.core_type = #tpu.core_type<tc>, window_params = [{transform_indices = @transform_0, window_bounds = array<i64: 16, 128>}, {pipeline_mode = #tpu.pipeline_mode<synchronous>, transform_indices = @transform_1, window_bounds = array<i64: 1, 128>}, {pipeline_mode = #tpu.pipeline_mode<synchronous>, transform_indices = @transform_2, window_bounds = array<i64: 1, 128>}, {pipeline_mode = #tpu.pipeline_mode<synchronous>, transform_indices = @transform_3, window_bounds = array<i64: 128, 384>}, {transform_indices = @transform_4, window_bounds = array<i64: 16, 384>}]} {
    %c0 = arith.constant 0 : index
    %c0_0 = arith.constant 0 : index
    %0 = vector.load %arg1[%c0, %c0_0] : memref<16x128xf32, #tpu.memory_space<vmem>>, vector<16x128xf32>
    %c0_1 = arith.constant 0 : index
    %c0_2 = arith.constant 0 : index
    %1 = vector.load %arg2[%c0_1, %c0_2] : memref<1x128xf32, #tpu.memory_space<vmem>>, vector<1x128xf32>
    %c0_3 = arith.constant 0 : index
    %c0_4 = arith.constant 0 : index
    %2 = vector.load %arg3[%c0_3, %c0_4] : memref<1x128xf32, #tpu.memory_space<vmem>>, vector<1x128xf32>
    %cst = arith.constant dense<0.000000e+00> : vector<16xf32>
    %3 = vector.multi_reduction <add>, %0, %cst [1] : vector<16x128xf32> to vector<16xf32>
    %4 = vector.shape_cast %3 : vector<16xf32> to vector<16x1xf32>
    %cst_5 = arith.constant 1.280000e+02 : f32
    %5 = vector.broadcast %cst_5 : f32 to vector<16x1xf32>
    %6 = arith.divf %4, %5 : vector<16x1xf32>
    %7 = vector.broadcast %6 : vector<16x1xf32> to vector<16x128xf32>
    %8 = arith.subf %0, %7 : vector<16x128xf32>
    %9 = arith.mulf %8, %8 : vector<16x128xf32>
    %cst_6 = arith.constant dense<0.000000e+00> : vector<16xf32>
    %10 = vector.multi_reduction <add>, %9, %cst_6 [1] : vector<16x128xf32> to vector<16xf32>
    %11 = vector.shape_cast %10 : vector<16xf32> to vector<16x1xf32>
    %cst_7 = arith.constant 1.280000e+02 : f32
    %12 = vector.broadcast %cst_7 : f32 to vector<16x1xf32>
    %13 = arith.divf %11, %12 : vector<16x1xf32>
    %14 = vector.broadcast %6 : vector<16x1xf32> to vector<16x128xf32>
    %15 = arith.subf %0, %14 : vector<16x128xf32>
    %cst_8 = arith.constant 9.99999974E-6 : f32
    %16 = vector.broadcast %cst_8 : f32 to vector<16x1xf32>
    %17 = arith.addf %13, %16 : vector<16x1xf32>
    %18 = math.rsqrt %17 : vector<16x1xf32>
    %19 = vector.broadcast %18 : vector<16x1xf32> to vector<16x128xf32>
    %20 = arith.mulf %15, %19 : vector<16x128xf32>
    %21 = vector.broadcast %1 : vector<1x128xf32> to vector<16x128xf32>
    %22 = arith.mulf %20, %21 : vector<16x128xf32>
    %23 = vector.broadcast %2 : vector<1x128xf32> to vector<16x128xf32>
    %24 = arith.addf %22, %23 : vector<16x128xf32>
    %25 = arith.truncf %24 : vector<16x128xf32> to vector<16x128xbf16>
    %c0_9 = arith.constant 0 : index
    %c0_10 = arith.constant 0 : index
    %26 = vector.load %arg4[%c0_9, %c0_10] : memref<128x384xbf16, #tpu.memory_space<vmem>>, vector<128x384xbf16>
    %cst_11 = arith.constant dense<0.000000e+00> : vector<16x384xf32>
    %27 = tpu.matmul %25, %26, %cst_11 {dimension_numbers = #tpu.dot_dimension_numbers<[1], [0], [0], [1], [0, 0, 1, 1], [], []>} : vector<16x128xbf16>, vector<128x384xbf16>, vector<16x384xf32> -> vector<16x384xf32>
    %28 = arith.truncf %27 : vector<16x384xf32> to vector<16x384xbf16>
    %c0_12 = arith.constant 0 : index
    %c0_13 = arith.constant 0 : index
    %29 = vector.load %arg5[%c0_12, %c0_13] : memref<16x384xbf16, #tpu.memory_space<vmem>>, vector<16x384xbf16>
    tpu.vector_store %arg5[%c0_12, %c0_13], %28 {strides = array<i32>} : memref<16x384xbf16, #tpu.memory_space<vmem>>, vector<16x384xbf16>,
    return
  }
  func.func @transform_0(%arg0: i32) -> (i32, i32) {
    %c0_i32 = arith.constant 0 : i32
    %c0_i32_0 = arith.constant 0 : i32
    return %arg0, %c0_i32 : i32, i32
  }
  func.func @transform_1(%arg0: i32) -> (i32, i32) {
    %c0_i32 = arith.constant 0 : i32
    %c0_i32_0 = arith.constant 0 : i32
    %c0_i32_1 = arith.constant 0 : i32
    return %c0_i32, %c0_i32_0 : i32, i32
  }
  func.func @transform_2(%arg0: i32) -> (i32, i32) {
    %c0_i32 = arith.constant 0 : i32
    %c0_i32_0 = arith.constant 0 : i32
    %c0_i32_1 = arith.constant 0 : i32
    return %c0_i32, %c0_i32_0 : i32, i32
  }
  func.func @transform_3(%arg0: i32) -> (i32, i32) {
    %c0_i32 = arith.constant 0 : i32
    %c0_i32_0 = arith.constant 0 : i32
    %c0_i32_1 = arith.constant 0 : i32
    return %c0_i32, %c0_i32_0 : i32, i32
  }
  func.func @transform_4(%arg0: i32) -> (i32, i32) {
    %c0_i32 = arith.constant 0 : i32
    %c0_i32_0 = arith.constant 0 : i32
    return %arg0, %c0_i32 : i32, i32
  }
}

</mosaic_0001>

<bundles_post_ra>
// kernel: tpu_custom_call.1
= control target key start
LH: loop header
LB: loop body
LE: loop exit
PB: predicated region body
PF: predicated region fallthrough
CT: control target
= control target key end

     0   :  { %9 = vsyncpa [#allocation3], 0  ;;  %s766_s0 = inlined_call_operand.hbm [shape: f32[16,128], index: 0, kind: input, shape index: {}]   ;;  %s767_s1 = inlined_call_operand.hbm [shape: f32[1,128], index: 1, kind: input, shape index: {}]   ;;  %s768_s2 = inlined_call_operand.hbm [shape: f32[1,128], index: 2, kind: input, shape index: {}]   ;;  %s769_s3 = inlined_call_operand.hbm [shape: bf16[128,384], index: 3, kind: input, shape index: {}]   ;;  %s770_s4 = inlined_call_operand.hbm [shape: bf16[16,384], index: 4, kind: output, shape index: {}]  }
   0x1   :  { %10 = vsyncpa [#allocation6], 0 }
   0x2   :  { %11 = vsyncpa [#allocation9], 0 }
   0x3   :  { %12 = vsyncpa [#allocation4], 0  ;;  %s630_s15 = smov [#allocation5]   ;;  %s631_s17 = smov [#allocation2]  }
   0x4   :  { %s31_s16 = sshll.u32 %s630_s15, 4  ;;  %s18_s18 = sshll.u32 %s631_s17, 4  ;;  %s32_s16 = int_to_ptr.vmem [resolvable:$true] %s31_s16  ;;  %s667_s18 = int_to_ptr.vmem [resolvable:$true] %s18_s18 }
   0x5   :  { %s512_s21 = scalar_lea.hbm %s767_s1, 16 }
   0x6   :  { %p513_p0 = scmp.ne.s32.totalorder %s767_s1, %s512_s21  ;;  %p516_p1 = scmp.lt.u32.totalorder %s512_s21, %s767_s1 }
   0x8   :  { %p518_p2 = pnand %p516_p1, %p513_p0 }
   0xa   :  { %521 = shalt.err (!%p518_p2)
}
   0xb   :  { %s522_s26 = scalar_lea.vmem %s32_s16, 16  ;;  %s526_s27 = scalar_lea.vmem %s32_s16, 32 }
   0xc   :  { %p523_p3 = scmp.ne.s32.totalorder %s32_s16, %s522_s26  ;;  %p527_p4 = scmp.lt.s32.totalorder %s32_s16, %s32_s16 }
   0xd   :  { %p528_p5 = scmp.lt.s32.totalorder %s526_s27, %s522_s26 }
   0xf   :  { %p529_p6 = por %p528_p5, %p527_p4 }
  0x11   :  { %p530_p7 = pnand %p529_p6, %p523_p3 }
  0x13   :  { %533 = shalt.err (!%p530_p7)
}
  0x14   :  { %34 = dma.hbm_to_vmem [thread:$0]  %s767_s1, 16, %s32_s16, [#allocation6]  }
  0x15   :  { %s534_s6 = scalar_lea.hbm %s766_s0, 256 }
  0x16   :  { %p535_p8 = scmp.ne.s32.totalorder %s766_s0, %s534_s6  ;;  %p538_p9 = scmp.lt.u32.totalorder %s534_s6, %s766_s0 }
  0x18   :  { %p540_p10 = pnand %p538_p9, %p535_p8 }
  0x1a   :  { %543 = shalt.err (!%p540_p10)
}
  0x1b   :  { %s544_s11 = scalar_lea.vmem %s667_s18, 256  ;;  %p549_p12 = scmp.lt.s32.totalorder %s667_s18, %s667_s18 }
  0x1c   :  { %p545_p11 = scmp.ne.s32.totalorder %s667_s18, %s544_s11  ;;  %p550_p13 = scmp.lt.s32.totalorder %s544_s11, %s544_s11 }
  0x1e   :  { %p551_p0 = por %p550_p13, %p549_p12 }
  0x20   :  { %p552_p1 = pnand %p551_p0, %p545_p11 }
  0x22   :  { %555 = shalt.err (!%p552_p1)
}
  0x23   :  { %s632_s1 = smov 128   ;;  %s633_s12 = smov 8  }
  0x24   :  { %24 = dma.hbm_to_vmem [thread:$0]  %s766_s0, 256, %s667_s18, [#allocation3], %s632_s1, %s632_s1, %s633_s12  }
  0x25   :  { %s634_s15 = smov [#allocation7]   ;;  %s635_s17 = smov [#allocation8]  }
  0x26   :  { %s41_s16 = sshll.u32 %s634_s15, 4  ;;  %s50_s19 = sshll.u32 %s635_s17, 4  ;;  %s42_s16 = int_to_ptr.vmem [resolvable:$true] %s41_s16  ;;  %s698_s19 = int_to_ptr.vmem [resolvable:$true] %s50_s19 }
  0x27   :  { %s556_s22 = scalar_lea.hbm %s768_s2, 16 }
  0x28   :  { %p557_p2 = scmp.ne.s32.totalorder %s768_s2, %s556_s22  ;;  %p560_p3 = scmp.lt.u32.totalorder %s556_s22, %s768_s2 }
  0x2a   :  { %p562_p4 = pnand %p560_p3, %p557_p2 }
  0x2c   :  { %565 = shalt.err (!%p562_p4)
}
  0x2d   :  { %s566_s0 = scalar_lea.vmem %s42_s16, 16  ;;  %s570_s18 = scalar_lea.vmem %s42_s16, 32 }
  0x2e   :  { %p567_p5 = scmp.ne.s32.totalorder %s42_s16, %s566_s0  ;;  %p571_p6 = scmp.lt.s32.totalorder %s42_s16, %s42_s16 }
  0x2f   :  { %p572_p7 = scmp.lt.s32.totalorder %s570_s18, %s566_s0 }
  0x31   :  { %p573_p8 = por %p572_p7, %p571_p6 }
  0x33   :  { %p574_p9 = pnand %p573_p8, %p567_p5 }
  0x35   :  { %577 = shalt.err (!%p574_p9)
}
  0x36   :  { %44 = dma.hbm_to_vmem [thread:$0]  %s768_s2, 16, %s42_s16, [#allocation6]  }
  0x37   :  { %s578_s5 = scalar_lea.hbm %s769_s3, 3072 }
  0x38   :  { %p579_p10 = scmp.ne.s32.totalorder %s769_s3, %s578_s5  ;;  %p582_p11 = scmp.lt.u32.totalorder %s578_s5, %s769_s3 }
  0x3a   :  { %p584_p12 = pnand %p582_p11, %p579_p10 }
  0x3c   :  { %587 = shalt.err (!%p584_p12)
}
  0x3d   :  { %s588_s10 = scalar_lea.vmem %s698_s19, 3072  ;;  %p593_p0 = scmp.lt.s32.totalorder %s698_s19, %s698_s19 }
  0x3e   :  { %p589_p13 = scmp.ne.s32.totalorder %s698_s19, %s588_s10  ;;  %p594_p1 = scmp.lt.s32.totalorder %s588_s10, %s588_s10 }
  0x40   :  { %p595_p2 = por %p594_p1, %p593_p0 }
  0x42   :  { %p596_p3 = pnand %p595_p2, %p589_p13 }
  0x44   :  { %599 = shalt.err (!%p596_p3)
}
  0x45   :  { %s636_s2 = smov 192   ;;  %s637_s11 = smov 12  }
  0x46   :  { %56 = dma.hbm_to_vmem [thread:$0]  %s769_s3, 3072, %s698_s19, [#allocation9], %s636_s2, %s636_s2, %s637_s11  }
  0x47   :  { %622 = dma.done.wait [#allocation3], 256  }
  0x48   :  { %623 = vsyncadd [#allocation3], 4294967040 }
  0x49   :  { %624 = dma.done.wait [#allocation6], 32  }
  0x4a   :  { %625 = vsyncadd [#allocation6], 4294967264 }
  0x4b   :  { %626 = dma.done.wait [#allocation9], 3072  }
  0x4c   :  { %627 = vsyncadd [#allocation9], 4294964224  ;;  %v70_v0 = vld [vmem:[#allocation2] sm:$0xff]  ;;  %v71_v1 = vld [vmem:[#allocation2 + $0x8] sm:$0xff]  ;;  %v638_v4 = vmov 0.0   ;;  %v639_v30 = vmov 0  }
  0x4d   :  { %74 = vadd.xlane.f32.xlu0 %v70_v0  ;;  %v476_v2 = vld [vmem:[#allocation8 + $0x4] ss:$12 sps:$4 sm:$0xff]   ;;  %v478_v3 = vld [vmem:[#allocation8] ss:$12 sps:$4 sm:$0xff]   ;;  %444 = vmatprep.subr.bf16.mxu1 %v638_v4  ;;  %v479_v5 = vld [vmem:[#allocation8 + $0x8] ss:$12 sps:$4 sm:$0xff]  }
  0x4e   :  { %v480_v6 = vld [vmem:[#allocation8 + $0x1c] ss:$12 sps:$4 sm:$0xff]   ;;  %274 = vmatprep.subr.bf16.mxu0 %v476_v2  ;;  %445 = vmatpush3.bf16.msra.mxu1 %v479_v5  ;;  %v482_v15 = vld [vmem:[#allocation8 + $0x18] ss:$12 sps:$4 sm:$0xff]   ;;  %v483_v16 = vld [vmem:[#allocation8 + $0x20] ss:$12 sps:$4 sm:$0xff]  }
  0x4f   :  { %275 = vmatpush1.bf16.msra.mxu0 %v478_v3  ;;  %446 = vmatprep.subr.bf16.mxu1 %v638_v4  ;;  %v484_v17 = vld [vmem:[#allocation8 + $0x34] ss:$12 sps:$4 sm:$0xff]   ;;  %v486_v18 = vld [vmem:[#allocation8 + $0x30] ss:$12 sps:$4 sm:$0xff]   ;;  %v487_v19 = vld [vmem:[#allocation8 + $0x38] ss:$12 sps:$4 sm:$0xff]  }
  0x50   :  { %276 = vmatprep.subr.bf16.mxu0 %v480_v6  ;;  %v488_v20 = vld [vmem:[#allocation8 + $0x4c] ss:$12 sps:$4 sm:$0xff]   ;;  %v490_v21 = vld [vmem:[#allocation8 + $0x48] ss:$12 sps:$4 sm:$0xff]   ;;  %v491_v22 = vld [vmem:[#allocation8 + $0x50] ss:$12 sps:$4 sm:$0xff]   ;;  %306 = vmatprep.mubr.bf16.mxu0 %v639_v30 }
  0x51   :  { %76 = vadd.xlane.f32.xlu0 %v71_v1  ;;  %v492_v23 = vld [vmem:[#allocation8 + $0x64] ss:$12 sps:$4 sm:$0xff]   ;;  %v494_v24 = vld [vmem:[#allocation8 + $0x60] ss:$12 sps:$4 sm:$0xff]   ;;  %v495_v25 = vld [vmem:[#allocation8 + $0x68] ss:$12 sps:$4 sm:$0xff]  }
  0x52   :  { %447 = vmatpush3.bf16.msra.mxu1 %v483_v16  ;;  %v496_v26 = vld [vmem:[#allocation8 + $0x7c] ss:$12 sps:$4 sm:$0xff]   ;;  %v498_v27 = vld [vmem:[#allocation8 + $0x78] ss:$12 sps:$4 sm:$0xff]   ;;  %v499_v28 = vld [vmem:[#allocation8 + $0x80] ss:$12 sps:$4 sm:$0xff]  }
  0x53   :  { %277 = vmatpush1.bf16.msra.mxu0 %v482_v15  ;;  %448 = vmatprep.subr.bf16.mxu1 %v638_v4  ;;  %v500_v29 = vld [vmem:[#allocation8 + $0x94] ss:$12 sps:$4 sm:$0xff]   ;;  %vm640_vm0 = vmmov 0   ;;  %v502_v31 = vld [vmem:[#allocation8 + $0x90] ss:$12 sps:$4 sm:$0xff]   ;;  %s641_s3 = smov [#allocation10]  }
  0x54   :  { %278 = vmatprep.subr.bf16.mxu0 %v484_v17  ;;  %460 = vmatprep.mubr.msk.bf16.mxu1 %vm640_vm0, %v638_v4  ;;  %v503_v32 = vld [vmem:[#allocation8 + $0x98] ss:$12 sps:$4 sm:$0xff]   ;;  %v506_v34 = vld [vmem:[#allocation8 + $0xa8] ss:$12 sps:$4 sm:$0xff]   ;;  %v507_v35 = vld [vmem:[#allocation8 + $0xb0] ss:$12 sps:$4 sm:$0xff]  }
  0x55   :  { %v504_v33 = vld [vmem:[#allocation8 + $0xac] ss:$12 sps:$4 sm:$0xff]   ;;  %v401_v44 = vld [vmem:[#allocation5] ss:$0 sm:$0xff]  ;;  %v402_v48 = vld [vmem:[#allocation7] ss:$0 sm:$0xff] }
  0x56   :  { %449 = vmatpush3.bf16.msra.mxu1 %v487_v19  ;;  %s387_s13 = sshll.u32 %s641_s3, 4  ;;  %s388_s13 = int_to_ptr.vmem [resolvable:$true] %s387_s13 }
  0x57   :  { %279 = vmatpush1.bf16.msra.mxu0 %v486_v18  ;;  %450 = vmatprep.subr.bf16.mxu1 %v638_v4  ;;  %s600_s14 = scalar_lea.vmem %s388_s13, 384  ;;  %p605_p5 = scmp.lt.s32.totalorder %s388_s13, %s388_s13 }
  0x58   :  { %280 = vmatprep.subr.bf16.mxu0 %v488_v20  ;;  %p601_p4 = scmp.ne.s32.totalorder %s388_s13, %s600_s14  ;;  %p606_p6 = scmp.lt.s32.totalorder %s600_s14, %s600_s14 }
  0x5a   :  { %451 = vmatpush3.bf16.msra.mxu1 %v491_v22  ;;  %p607_p7 = por %p606_p6, %p605_p5 }
  0x5b   :  { %281 = vmatpush1.bf16.msra.mxu0 %v490_v21  ;;  %452 = vmatprep.subr.bf16.mxu1 %v638_v4 }
  0x5c   :  { %282 = vmatprep.subr.bf16.mxu0 %v492_v23  ;;  %p608_p8 = pnand %p607_p7, %p601_p4 }
  0x5e   :  { %453 = vmatpush3.bf16.msra.mxu1 %v495_v25 }
  0x5f   :  { %283 = vmatpush1.bf16.msra.mxu0 %v494_v24  ;;  %454 = vmatprep.subr.bf16.mxu1 %v638_v4 }
  0x60   :  { %284 = vmatprep.subr.bf16.mxu0 %v496_v26 }
  0x62   :  { %455 = vmatpush3.bf16.msra.mxu1 %v499_v28 }
  0x63   :  { %285 = vmatpush1.bf16.msra.mxu0 %v498_v27  ;;  %456 = vmatprep.subr.bf16.mxu1 %v638_v4 }
  0x64   :  { %286 = vmatprep.subr.bf16.mxu0 %v500_v29 }
  0x66   :  { %457 = vmatpush3.bf16.msra.mxu1 %v503_v32 }
  0x67   :  { %287 = vmatpush1.bf16.msra.mxu0 %v502_v31  ;;  %458 = vmatprep.subr.bf16.mxu1 %v638_v4 }
  0x68   :  { %288 = vmatprep.subr.bf16.mxu0 %v504_v33 }
  0x6a   :  { %459 = vmatpush3.bf16.msra.mxu1 %v507_v35 }
  0x6b   :  { %289 = vmatpush1.bf16.msra.mxu0 %v506_v34 }
  0xda   :  { %v75_v7 = vpop.xlane.xlu0 %74 }
  0xdb   :  { %v79_v8 = vmul.f32 0.0078125, %v75_v7 }
  0xdd   :  { %v734_v9 = vsub.f32 %v70_v0, %v79_v8 }
  0xde   :  { %v77_v10 = vpop.xlane.xlu0 %76 }
  0xdf   :  { %v80_v11 = vmul.f32 0.0078125, %v77_v10  ;;  %v83_v12 = vmul.f32 %v734_v9, %v734_v9 }
  0xe1   :  { %v738_v13 = vsub.f32 %v71_v1, %v80_v11  ;;  %85 = vadd.xlane.f32.xlu1 %v83_v12 }
  0xe3   :  { %v84_v14 = vmul.f32 %v738_v13, %v738_v13 }
  0xe5   :  { %87 = vadd.xlane.f32.xlu1 %v84_v14 }
 0x16e   :  { %v86_v36 = vpop.xlane.xlu1 %85 }
 0x16f   :  { %v89_v37 = vmul.f32 0.0078125, %v86_v36 }
 0x171   :  { %v91_v38 = vadd.f32 1e-05, %v89_v37 }
 0x172   :  { %v88_v39 = vpop.xlane.xlu1 %87 }
 0x173   :  { %508 = vrsqrt.f32 %v91_v38  ;;  %v90_v40 = vmul.f32 0.0078125, %v88_v39 }
 0x175   :  { %v92_v41 = vadd.f32 1e-05, %v90_v40 }
 0x177   :  { %510 = vrsqrt.f32 %v92_v41 }
 0x17d   :  { %v509_v42 = vpop.eup %508 }
 0x17e   :  { %v95_v43 = vmul.f32 %v509_v42, %v734_v9 }
 0x180   :  { %v103_v47 = vmul.f32 %v401_v44, %v95_v43 }
 0x181   :  { %v511_v45 = vpop.eup %510 }
 0x182   :  { %v96_v46 = vmul.f32 %v511_v45, %v738_v13  ;;  %v111_v50 = vadd.f32 %v402_v48, %v103_v47 }
 0x184   :  { %v104_v49 = vmul.f32 %v401_v44, %v96_v46 }
 0x186   :  { %v112_v51 = vadd.f32 %v402_v48, %v104_v49 }
 0x188   :  { %v113_v52 = vpack.c.bf16 %v112_v51, %v111_v50 }
 0x18a   :  { %307 = vmatmul.mubr.bf16.vlgmr.msra.gmra.mrb[0].mxu0 %v113_v52  ;;  %461 = vmatmul.mubr.bf16.vlgmr.msra.gmra.mrb[0].mxu1 %v113_v52 }
 0x25d   :  { %v308_v53 = vpop.f32.mrb[0].mxu0  ;;  %v351_v54 = vpop.f32.mrb[0].mxu1 }
 0x25e   :  { %v432_v55 = vpack.c.bf16 %v351_v54, %v351_v54  ;;  %v310_v56 = vpop.f32.mrb[1].mxu0  ;;  %v462_v57 = vpop.f32.mrb[1].mxu1 }
 0x25f   :  { %v431_v58 = vpack.c.bf16 %v310_v56, %v308_v53  ;;  %v312_v59 = vpop.f32.mrb[2].mxu0  ;;  %v354_v60 = vpop.f32.mrb[2].mxu1 }
 0x260   :  { %379 = vst [vmem:[#allocation10 + $0x8] sm:$0xf] %v432_v55  ;;  %v434_v61 = vpack.c.bf16 %v354_v60, %v354_v60  ;;  %v314_v62 = vpop.f32.mrb[3].mxu0  ;;  %v463_v63 = vpop.f32.mrb[3].mxu1 }
 0x261   :  { %378 = vst [vmem:[#allocation10] sm:$0xff] %v431_v58  ;;  %v433_v0 = vpack.c.bf16 %v314_v62, %v312_v59 }
 0x262   :  { %381 = vst [vmem:[#allocation10 + $0x14] sm:$0xf] %v434_v61 }
 0x263   :  { %380 = vst [vmem:[#allocation10 + $0xc] sm:$0xff] %v433_v0 }
 0x264   :  { %611 = shalt.err (!%p608_p8)
}
 0x265   :  { %s612_s17 = scalar_lea.hbm %s770_s4, 384 }
 0x266   :  { %p613_p9 = scmp.ne.s32.totalorder %s770_s4, %s612_s17  ;;  %p616_p10 = scmp.lt.u32.totalorder %s612_s17, %s770_s4 }
 0x268   :  { %p618_p11 = pnand %p616_p10, %p613_p9 }
 0x26a   :  { %621 = shalt.err (!%p618_p11)
}
 0x26b   :  { %393 = dma.vmem_to_hbm [thread:$0]  %s388_s13, 384, %s770_s4, [#allocation4], %s636_s2, %s636_s2, %s637_s11  }
 0x26c   :  { %628 = dma.done.wait [#allocation4], 384  }
 0x26d   :  { %629 = vsyncadd [#allocation4], 4294966912 }
 0x26e   :  { %397 = vsyncpa [#allocation3], 1 }
 0x26f   :  { %398 = vsyncpa [#allocation6], 1 }
 0x270   :  { %399 = vsyncpa [#allocation9], 1 }
 0x271   :  { %400 = vsyncpa [#allocation4], 1 }

</bundles_post_ra>
